<compile_context>
chip_gen: v7x
topology: tpu7x:2x2x1
jax: 0.10.0
libtpu: 0.0.40
codegen_flags: <defaults>
</compile_context>

<pallas_src>
import math

import jax
import jax.numpy as jnp
from jax.experimental import pallas as pl
from jax.experimental.pallas import tpu as pltpu


# Total (inputs + output) byte budget for the single-block VMEM pack path.
# Safely under scoped-VMEM defaults on all generations (16 MiB v5e,
# 32 MiB v6e/v7x) with no vmem_limit override needed.
_VMEM_PACK_MAX_BYTES = 8 * 1024 * 1024


def _slice_along(dim, ndim, start, size):
    """Static N-D index tuple selecting [start:start+size) along `dim`."""
    return ((slice(None),) * dim
            + (slice(start, start + size),)
            + (slice(None),) * (ndim - dim - 1))


# ---------------------------------------------------------------------------
# Path 1: small concats -> single-block VMEM pack kernel (lane-dense stores,
# cast-on-copy in vregs).
# ---------------------------------------------------------------------------
def _make_vmem_pack_kernel(n_inputs, dim, ndim, offsets, sizes, out_dtype):
    def kernel(*refs):
        in_refs = refs[:n_inputs]
        out_ref = refs[n_inputs]
        for src, off, size in zip(in_refs, offsets, sizes):
            out_ref[_slice_along(dim, ndim, off, size)] = (
                src[...].astype(out_dtype))
    return kernel


def _concat_vmem(inputs, dim, offsets, sizes, out_shape, out_dtype):
    ndim = len(out_shape)
    kernel = _make_vmem_pack_kernel(
        len(inputs), dim, ndim, offsets, sizes, out_dtype)
    vmem_spec = pl.BlockSpec(memory_space=pltpu.MemorySpace.VMEM)
    total_bytes = (sum(x.size * x.dtype.itemsize for x in inputs)
                   + math.prod(out_shape) * jnp.dtype(out_dtype).itemsize)
    return pl.pallas_call(
        kernel,
        out_shape=jax.ShapeDtypeStruct(out_shape, out_dtype),
        in_specs=[vmem_spec] * len(inputs),
        out_specs=vmem_spec,
        cost_estimate=pl.CostEstimate(
            flops=0, transcendentals=0, bytes_accessed=total_bytes),
    )(*inputs)


# ---------------------------------------------------------------------------
# Path 2: large concats -> HBM->HBM DMA kernel, copies sharded across a
# "parallel" grid of 2 so v7x's two TensorCores split the work.
# ---------------------------------------------------------------------------
def _make_dma_concat_kernel(n_inputs, dim, ndim, offsets, sizes,
                            shard_assignments):
    def kernel(*refs):
        in_refs = refs[:n_inputs]
        out_ref = refs[n_inputs]
        sems = refs[n_inputs + 1]

        for shard_idx, assignment in enumerate(shard_assignments):
            @pl.when(pl.program_id(0) == shard_idx)
            def _run(assignment=assignment):
                copies = []
                # Issue every DMA of this shard first (largest-first,
                # all concurrent), then wait on all of them.
                for i in assignment:
                    dst = out_ref.at[
                        _slice_along(dim, ndim, offsets[i], sizes[i])]
                    cp = pltpu.make_async_copy(in_refs[i], dst, sems.at[i])
                    cp.start()
                    copies.append(cp)
                for cp in copies:
                    cp.wait()
    return kernel


def _concat_dma(inputs, dim, offsets, sizes, out_shape, out_dtype):
    ndim = len(out_shape)

    # Only cast inputs whose dtype actually differs (same-dtype case is a
    # guaranteed no-op at trace time).
    inputs = [x if x.dtype == out_dtype else x.astype(out_dtype)
              for x in inputs]
    n = len(inputs)

    # Balance inputs across (up to) two shards by byte count so the copy work
    # is split over v7x's two TensorCores; within each shard issue the largest
    # copies first.  On single-TC chips the shards just run back to back.
    num_shards = 2 if n >= 2 else 1
    order = sorted(range(n),
                   key=lambda i: inputs[i].size * inputs[i].dtype.itemsize,
                   reverse=True)
    shard_assignments = [[] for _ in range(num_shards)]
    shard_bytes = [0] * num_shards
    for i in order:
        s = min(range(num_shards), key=lambda j: shard_bytes[j])
        shard_assignments[s].append(i)
        shard_bytes[s] += inputs[i].size * inputs[i].dtype.itemsize

    total_bytes = sum(x.size * x.dtype.itemsize for x in inputs)
    kernel = _make_dma_concat_kernel(
        n, dim, ndim, offsets, sizes, shard_assignments)

    return pl.pallas_call(
        kernel,
        out_shape=jax.ShapeDtypeStruct(out_shape, out_dtype),
        grid=(num_shards,),
        in_specs=[pl.BlockSpec(memory_space=pl.ANY)] * n,
        out_specs=pl.BlockSpec(memory_space=pl.ANY),
        scratch_shapes=[pltpu.SemaphoreType.DMA((n,))],
        compiler_params=pltpu.CompilerParams(
            dimension_semantics=("parallel",)),
        cost_estimate=pl.CostEstimate(
            flops=0, transcendentals=0, bytes_accessed=2 * total_bytes),
    )(*inputs)


# ---------------------------------------------------------------------------
# Public wrapper: torch.cat(inputs, dim=dim) semantics.
# ---------------------------------------------------------------------------
def concatenate(*inputs, dim: int = 1, force_dma: bool = False):
    if not inputs:
        raise ValueError("concatenate() needs at least one input")
    ndim = inputs[0].ndim
    if any(x.ndim != ndim for x in inputs):
        raise ValueError("all inputs must have the same rank")
    dim = dim % ndim  # normalize negative dims, matching torch semantics

    ref_shape = tuple(inputs[0].shape)
    for x in inputs:
        for d in range(ndim):
            if d != dim and x.shape[d] != ref_shape[d]:
                raise ValueError(
                    f"Sizes of tensors must match except in dimension {dim}: "
                    f"got {tuple(x.shape)} vs {ref_shape}")

    out_dtype = jnp.result_type(*[x.dtype for x in inputs])
    out_shape = list(ref_shape)
    out_shape[dim] = sum(int(x.shape[dim]) for x in inputs)
    out_shape = tuple(out_shape)

    # Skip zero-size inputs at trace time (torch.cat accepts empty tensors,
    # and 0-byte DMAs are pointless / fragile).
    nonempty = [x for x in inputs if x.shape[dim] > 0]
    if not nonempty:
        return jnp.zeros(out_shape, out_dtype)
    if len(nonempty) == 1:
        return nonempty[0].astype(out_dtype)

    sizes = [int(x.shape[dim]) for x in nonempty]
    offsets, off = [], 0
    for c in sizes:
        offsets.append(off)
        off += c

    in_bytes = sum(x.size * x.dtype.itemsize for x in nonempty)
    out_bytes = math.prod(out_shape) * jnp.dtype(out_dtype).itemsize

    if not force_dma and (in_bytes + out_bytes) <= _VMEM_PACK_MAX_BYTES:
        return _concat_vmem(nonempty, dim, offsets, sizes, out_shape, out_dtype)
    return _concat_dma(nonempty, dim, offsets, sizes, out_shape, out_dtype)


if __name__ == "__main__":
    key = jax.random.PRNGKey(0)
    k1, k2, k3 = jax.random.split(key, 3)

    # Small NCHW inputs differing only along the concat dim (channels).
    x1 = jax.random.normal(k1, (2, 4, 16, 16), dtype=jnp.float32)
    x2 = jax.random.normal(k2, (2, 6, 16, 16), dtype=jnp.float32)
    x3 = jax.random.normal(k3, (2, 2, 16, 16), dtype=jnp.float32)

    ref = jnp.concatenate([x1, x2, x3], axis=1)

    # Default dispatch -> single-block VMEM pack path (small tensors).
    out_vmem = jax.block_until_ready(concatenate(x1, x2, x3, dim=1))
    assert out_vmem.shape == (2, 12, 16, 16), out_vmem.shape
    assert jnp.array_equal(out_vmem, ref), "VMEM path mismatch vs reference"

    # Force the large-tensor HBM->HBM DMA path on the same data to make sure
    # it also compiles and runs cleanly (2-way parallel grid, original rank).
    out_dma = jax.block_until_ready(
        concatenate(x1, x2, x3, dim=1, force_dma=True))
    assert jnp.array_equal(out_dma, ref), "DMA path mismatch vs reference"

    # Different concat dim + mixed dtypes (cast-on-copy inside the kernel).
    y1 = jax.random.normal(k1, (2, 4, 16, 16), dtype=jnp.float32)
    y2 = jax.random.normal(k2, (3, 4, 16, 16), dtype=jnp.bfloat16)
    out_mixed = jax.block_until_ready(concatenate(y1, y2, dim=0))
    ref_mixed = jnp.concatenate([y1, y2.astype(jnp.float32)], axis=0)
    assert out_mixed.dtype == jnp.float32
    assert jnp.array_equal(out_mixed, ref_mixed), "mixed-dtype path mismatch"

    print("KERNEL_OK")
</pallas_src>

<mosaic_0001>
module attributes {stable_mosaic.version = 11 : i64} {
  func.func @kernel(%arg0: memref<2x4x16x16xf32, #tpu.memory_space<vmem>>, %arg1: memref<2x6x16x16xf32, #tpu.memory_space<vmem>>, %arg2: memref<2x2x16x16xf32, #tpu.memory_space<vmem>>, %arg3: memref<2x12x16x16xf32, #tpu.memory_space<vmem>>) attributes {dimension_semantics = [], scalar_prefetch = 0 : i64, scratch_operands = 0 : i64, tpu.core_type = #tpu.core_type<tc>} {
    %c0 = arith.constant 0 : index
    %c0_0 = arith.constant 0 : index
    %c0_1 = arith.constant 0 : index
    %c0_2 = arith.constant 0 : index
    %0 = vector.load %arg0[%c0, %c0_0, %c0_1, %c0_2] : memref<2x4x16x16xf32, #tpu.memory_space<vmem>>, vector<2x4x16x16xf32>
    %c0_3 = arith.constant 0 : index
    %c0_4 = arith.constant 0 : index
    %c0_5 = arith.constant 0 : index
    %c0_6 = arith.constant 0 : index
    %1 = vector.load %arg3[%c0_3, %c0_4, %c0_5, %c0_6] : memref<2x12x16x16xf32, #tpu.memory_space<vmem>>, vector<2x4x16x16xf32>
    tpu.vector_store %arg3[%c0_3, %c0_4, %c0_5, %c0_6], %0 {strides = array<i32>} : memref<2x12x16x16xf32, #tpu.memory_space<vmem>>, vector<2x4x16x16xf32>,
    %c0_7 = arith.constant 0 : index
    %c0_8 = arith.constant 0 : index
    %c0_9 = arith.constant 0 : index
    %c0_10 = arith.constant 0 : index
    %2 = vector.load %arg1[%c0_7, %c0_8, %c0_9, %c0_10] : memref<2x6x16x16xf32, #tpu.memory_space<vmem>>, vector<2x6x16x16xf32>
    %c0_11 = arith.constant 0 : index
    %c4 = arith.constant 4 : index
    %c0_12 = arith.constant 0 : index
    %c0_13 = arith.constant 0 : index
    %3 = vector.load %arg3[%c0_11, %c4, %c0_12, %c0_13] : memref<2x12x16x16xf32, #tpu.memory_space<vmem>>, vector<2x6x16x16xf32>
    tpu.vector_store %arg3[%c0_11, %c4, %c0_12, %c0_13], %2 {strides = array<i32>} : memref<2x12x16x16xf32, #tpu.memory_space<vmem>>, vector<2x6x16x16xf32>,
    %c0_14 = arith.constant 0 : index
    %c0_15 = arith.constant 0 : index
    %c0_16 = arith.constant 0 : index
    %c0_17 = arith.constant 0 : index
    %4 = vector.load %arg2[%c0_14, %c0_15, %c0_16, %c0_17] : memref<2x2x16x16xf32, #tpu.memory_space<vmem>>, vector<2x2x16x16xf32>
    %c0_18 = arith.constant 0 : index
    %c10 = arith.constant 10 : index
    %c0_19 = arith.constant 0 : index
    %c0_20 = arith.constant 0 : index
    %5 = vector.load %arg3[%c0_18, %c10, %c0_19, %c0_20] : memref<2x12x16x16xf32, #tpu.memory_space<vmem>>, vector<2x2x16x16xf32>
    tpu.vector_store %arg3[%c0_18, %c10, %c0_19, %c0_20], %4 {strides = array<i32>} : memref<2x12x16x16xf32, #tpu.memory_space<vmem>>, vector<2x2x16x16xf32>,
    return
  }
}

</mosaic_0001>

<bundles_post_ra>
// kernel: tpu_custom_call.1
= control target key start
LH: loop header
LB: loop body
LE: loop exit
PB: predicated region body
PF: predicated region fallthrough
CT: control target
= control target key end

     0   :  { %8 = vsyncpa [#allocation3], 0  ;;  %s414_s0 = inlined_call_operand.hbm [shape: f32[2,4,16,16], index: 0, kind: input, shape index: {}]   ;;  %s415_s1 = inlined_call_operand.hbm [shape: f32[2,6,16,16], index: 1, kind: input, shape index: {}]   ;;  %s416_s2 = inlined_call_operand.hbm [shape: f32[2,2,16,16], index: 2, kind: input, shape index: {}]   ;;  %s417_s3 = inlined_call_operand.hbm [shape: f32[2,12,16,16], index: 3, kind: output, shape index: {}]  }
   0x1   :  { %9 = vsyncpa [#allocation6], 0 }
   0x2   :  { %10 = vsyncpa [#allocation4], 0  ;;  %s273_s12 = smov [#allocation5]   ;;  %s274_s14 = smov [#allocation2]  }
   0x3   :  { %s28_s13 = sshll.u32 %s273_s12, 4  ;;  %s16_s15 = sshll.u32 %s274_s14, 4  ;;  %s29_s13 = int_to_ptr.vmem [resolvable:$true] %s28_s13  ;;  %s299_s15 = int_to_ptr.vmem [resolvable:$true] %s16_s15 }
   0x4   :  { %s179_s18 = scalar_lea.hbm %s415_s1, 3072 }
   0x5   :  { %p180_p0 = scmp.ne.s32.totalorder %s415_s1, %s179_s18  ;;  %p183_p1 = scmp.lt.u32.totalorder %s179_s18, %s415_s1 }
   0x7   :  { %p185_p2 = pnand %p183_p1, %p180_p0 }
   0x9   :  { %188 = shalt.err (!%p185_p2)
}
   0xa   :  { %s189_s23 = scalar_lea.vmem %s29_s13, 3072  ;;  %p194_p4 = scmp.lt.s32.totalorder %s29_s13, %s29_s13 }
   0xb   :  { %p190_p3 = scmp.ne.s32.totalorder %s29_s13, %s189_s23  ;;  %p195_p5 = scmp.lt.s32.totalorder %s189_s23, %s189_s23 }
   0xd   :  { %p196_p6 = por %p195_p5, %p194_p4 }
   0xf   :  { %p197_p7 = pnand %p196_p6, %p190_p3 }
  0x11   :  { %200 = shalt.err (!%p197_p7)
}
  0x12   :  { %s275_s24 = smov 128   ;;  %s276_s25 = smov 8  }
  0x13   :  { %34 = dma.hbm_to_vmem [thread:$0]  %s415_s1, 3072, %s29_s13, [#allocation6], %s275_s24, %s275_s24, %s276_s25  }
  0x14   :  { %s201_s30 = scalar_lea.hbm %s414_s0, 2048 }
  0x15   :  { %p202_p8 = scmp.ne.s32.totalorder %s414_s0, %s201_s30  ;;  %p205_p9 = scmp.lt.u32.totalorder %s201_s30, %s414_s0 }
  0x17   :  { %p207_p10 = pnand %p205_p9, %p202_p8 }
  0x19   :  { %210 = shalt.err (!%p207_p10)
}
  0x1a   :  { %s211_s8 = scalar_lea.vmem %s299_s15, 2048  ;;  %p216_p12 = scmp.lt.s32.totalorder %s299_s15, %s299_s15 }
  0x1b   :  { %p212_p11 = scmp.ne.s32.totalorder %s299_s15, %s211_s8  ;;  %p217_p13 = scmp.lt.s32.totalorder %s211_s8, %s211_s8 }
  0x1d   :  { %p218_p0 = por %p217_p13, %p216_p12 }
  0x1f   :  { %p219_p1 = pnand %p218_p0, %p212_p11 }
  0x21   :  { %222 = shalt.err (!%p219_p1)
}
  0x22   :  { %22 = dma.hbm_to_vmem [thread:$0]  %s414_s0, 2048, %s299_s15, [#allocation3], %s275_s24, %s275_s24, %s276_s25  }
  0x23   :  { %s277_s10 = smov [#allocation7]   ;;  %s223_s14 = scalar_lea.hbm %s416_s2, 1024 }
  0x24   :  { %s40_s11 = sshll.u32 %s277_s10, 4  ;;  %p224_p2 = scmp.ne.s32.totalorder %s416_s2, %s223_s14  ;;  %s41_s11 = int_to_ptr.vmem [resolvable:$true] %s40_s11 }
  0x25   :  { %p227_p3 = scmp.lt.u32.totalorder %s223_s14, %s416_s2 }
  0x27   :  { %p229_p4 = pnand %p227_p3, %p224_p2 }
  0x29   :  { %232 = shalt.err (!%p229_p4)
}
  0x2a   :  { %s233_s20 = scalar_lea.vmem %s41_s11, 1024  ;;  %p238_p6 = scmp.lt.s32.totalorder %s41_s11, %s41_s11 }
  0x2b   :  { %p234_p5 = scmp.ne.s32.totalorder %s41_s11, %s233_s20  ;;  %p239_p7 = scmp.lt.s32.totalorder %s233_s20, %s233_s20 }
  0x2d   :  { %p240_p8 = por %p239_p7, %p238_p6 }
  0x2f   :  { %p241_p9 = pnand %p240_p8, %p234_p5 }
  0x31   :  { %244 = shalt.err (!%p241_p9)
}
  0x32   :  { %46 = dma.hbm_to_vmem [thread:$0]  %s416_s2, 1024, %s41_s11, [#allocation6], %s275_s24, %s275_s24, %s276_s25  }
  0x33   :  { %267 = dma.done.wait [#allocation3], 2048  }
  0x34   :  { %268 = vsyncadd [#allocation3], 4294965248 }
  0x35   :  { %269 = dma.done.wait [#allocation6], 4096  }
  0x36   :  { %270 = vsyncadd [#allocation6], 4294963200  ;;  %vm72_vm0 = vcmask 130048   ;;  %v56_v0 = vld [vmem:[#allocation2] sm:$0xff]  ;;  %v57_v1 = vld [vmem:[#allocation2 + $0x8] sm:$0xff]  ;;  %s278_s2 = smov [#allocation8]  }
  0x37   :  { %v58_v2 = vld [vmem:[#allocation2 + $0x10] sm:$0xff]  ;;  %73 = vst.msk [vmem:[#allocation8] sm:$0xff] %vm72_vm0, %v56_v0  ;;  %74 = vst.msk [vmem:[#allocation8 + $0x8] sm:$0xff] %vm72_vm0, %v57_v1  ;;  %v59_v3 = vld [vmem:[#allocation2 + $0x18] sm:$0xff]  ;;  %s160_s21 = sshll.u32 %s278_s2, 4  ;;  %s161_s21 = int_to_ptr.vmem [resolvable:$true] %s160_s21 }
  0x38   :  { %75 = vst.msk [vmem:[#allocation8 + $0x10] sm:$0xff] %vm72_vm0, %v58_v2  ;;  %v60_v4 = vld [vmem:[#allocation2 + $0x20] sm:$0xff]  ;;  %v61_v5 = vld [vmem:[#allocation2 + $0x28] sm:$0xff]  ;;  %76 = vst.msk [vmem:[#allocation8 + $0x18] sm:$0xff] %vm72_vm0, %v59_v3  ;;  %s245_s22 = scalar_lea.vmem %s161_s21, 6144  ;;  %p250_p11 = scmp.lt.s32.totalorder %s161_s21, %s161_s21 }
  0x39   :  { %77 = vst.msk [vmem:[#allocation8 + $0x20] sm:$0xff] %vm72_vm0, %v60_v4  ;;  %78 = vst.msk [vmem:[#allocation8 + $0x28] sm:$0xff] %vm72_vm0, %v61_v5  ;;  %v62_v6 = vld [vmem:[#allocation2 + $0x30] sm:$0xff]  ;;  %v63_v7 = vld [vmem:[#allocation2 + $0x38] sm:$0xff]  ;;  %p246_p10 = scmp.ne.s32.totalorder %s161_s21, %s245_s22  ;;  %p251_p12 = scmp.lt.s32.totalorder %s245_s22, %s245_s22 }
  0x3a   :  { %v64_v8 = vld [vmem:[#allocation2 + $0x40] sm:$0xff]  ;;  %79 = vst.msk [vmem:[#allocation8 + $0x30] sm:$0xff] %vm72_vm0, %v62_v6  ;;  %80 = vst.msk [vmem:[#allocation8 + $0x38] sm:$0xff] %vm72_vm0, %v63_v7  ;;  %v65_v9 = vld [vmem:[#allocation2 + $0x48] sm:$0xff] }
  0x3b   :  { %81 = vst.msk [vmem:[#allocation8 + $0xc0] sm:$0xff] %vm72_vm0, %v64_v8  ;;  %v66_v10 = vld [vmem:[#allocation2 + $0x50] sm:$0xff]  ;;  %v67_v11 = vld [vmem:[#allocation2 + $0x58] sm:$0xff]  ;;  %82 = vst.msk [vmem:[#allocation8 + $0xc8] sm:$0xff] %vm72_vm0, %v65_v9  ;;  %p252_p13 = por %p251_p12, %p250_p11 }
  0x3c   :  { %83 = vst.msk [vmem:[#allocation8 + $0xd0] sm:$0xff] %vm72_vm0, %v66_v10  ;;  %84 = vst.msk [vmem:[#allocation8 + $0xd8] sm:$0xff] %vm72_vm0, %v67_v11  ;;  %v68_v12 = vld [vmem:[#allocation2 + $0x60] sm:$0xff]  ;;  %v69_v13 = vld [vmem:[#allocation2 + $0x68] sm:$0xff] }
  0x3d   :  { %v70_v14 = vld [vmem:[#allocation2 + $0x70] sm:$0xff]  ;;  %85 = vst.msk [vmem:[#allocation8 + $0xe0] sm:$0xff] %vm72_vm0, %v68_v12  ;;  %86 = vst.msk [vmem:[#allocation8 + $0xe8] sm:$0xff] %vm72_vm0, %v69_v13  ;;  %v71_v15 = vld [vmem:[#allocation2 + $0x78] sm:$0xff]  ;;  %p253_p0 = pnand %p252_p13, %p246_p10 }
  0x3e   :  { %87 = vst.msk [vmem:[#allocation8 + $0xf0] sm:$0xff] %vm72_vm0, %v70_v14  ;;  %v89_v16 = vld [vmem:[#allocation5] sm:$0xff]  ;;  %v90_v17 = vld [vmem:[#allocation5 + $0x8] sm:$0xff]  ;;  %88 = vst.msk [vmem:[#allocation8 + $0xf8] sm:$0xff] %vm72_vm0, %v71_v15 }
  0x3f   :  { %114 = vst.msk [vmem:[#allocation8 + $0x40] sm:$0xff] %vm72_vm0, %v89_v16  ;;  %115 = vst.msk [vmem:[#allocation8 + $0x48] sm:$0xff] %vm72_vm0, %v90_v17  ;;  %v91_v18 = vld [vmem:[#allocation5 + $0x10] sm:$0xff]  ;;  %v92_v19 = vld [vmem:[#allocation5 + $0x18] sm:$0xff] }
  0x40   :  { %v93_v20 = vld [vmem:[#allocation5 + $0x20] sm:$0xff]  ;;  %116 = vst.msk [vmem:[#allocation8 + $0x50] sm:$0xff] %vm72_vm0, %v91_v18  ;;  %117 = vst.msk [vmem:[#allocation8 + $0x58] sm:$0xff] %vm72_vm0, %v92_v19  ;;  %v94_v21 = vld [vmem:[#allocation5 + $0x28] sm:$0xff] }
  0x41   :  { %118 = vst.msk [vmem:[#allocation8 + $0x60] sm:$0xff] %vm72_vm0, %v93_v20  ;;  %v95_v22 = vld [vmem:[#allocation5 + $0x30] sm:$0xff]  ;;  %v96_v23 = vld [vmem:[#allocation5 + $0x38] sm:$0xff]  ;;  %119 = vst.msk [vmem:[#allocation8 + $0x68] sm:$0xff] %vm72_vm0, %v94_v21 }
  0x42   :  { %120 = vst.msk [vmem:[#allocation8 + $0x70] sm:$0xff] %vm72_vm0, %v95_v22  ;;  %121 = vst.msk [vmem:[#allocation8 + $0x78] sm:$0xff] %vm72_vm0, %v96_v23  ;;  %v97_v24 = vld [vmem:[#allocation5 + $0x40] sm:$0xff]  ;;  %v98_v25 = vld [vmem:[#allocation5 + $0x48] sm:$0xff] }
  0x43   :  { %v99_v26 = vld [vmem:[#allocation5 + $0x50] sm:$0xff]  ;;  %122 = vst.msk [vmem:[#allocation8 + $0x80] sm:$0xff] %vm72_vm0, %v97_v24  ;;  %123 = vst.msk [vmem:[#allocation8 + $0x88] sm:$0xff] %vm72_vm0, %v98_v25  ;;  %v100_v27 = vld [vmem:[#allocation5 + $0x58] sm:$0xff] }
  0x44   :  { %124 = vst.msk [vmem:[#allocation8 + $0x90] sm:$0xff] %vm72_vm0, %v99_v26  ;;  %v101_v28 = vld [vmem:[#allocation5 + $0x60] sm:$0xff]  ;;  %v102_v29 = vld [vmem:[#allocation5 + $0x68] sm:$0xff]  ;;  %125 = vst.msk [vmem:[#allocation8 + $0x98] sm:$0xff] %vm72_vm0, %v100_v27 }
  0x45   :  { %126 = vst.msk [vmem:[#allocation8 + $0x100] sm:$0xff] %vm72_vm0, %v101_v28  ;;  %127 = vst.msk [vmem:[#allocation8 + $0x108] sm:$0xff] %vm72_vm0, %v102_v29  ;;  %v103_v30 = vld [vmem:[#allocation5 + $0x70] sm:$0xff]  ;;  %v104_v31 = vld [vmem:[#allocation5 + $0x78] sm:$0xff] }
  0x46   :  { %v105_v32 = vld [vmem:[#allocation5 + $0x80] sm:$0xff]  ;;  %128 = vst.msk [vmem:[#allocation8 + $0x110] sm:$0xff] %vm72_vm0, %v103_v30  ;;  %129 = vst.msk [vmem:[#allocation8 + $0x118] sm:$0xff] %vm72_vm0, %v104_v31  ;;  %v106_v33 = vld [vmem:[#allocation5 + $0x88] sm:$0xff] }
  0x47   :  { %130 = vst.msk [vmem:[#allocation8 + $0x120] sm:$0xff] %vm72_vm0, %v105_v32  ;;  %v107_v34 = vld [vmem:[#allocation5 + $0x90] sm:$0xff]  ;;  %v108_v35 = vld [vmem:[#allocation5 + $0x98] sm:$0xff]  ;;  %131 = vst.msk [vmem:[#allocation8 + $0x128] sm:$0xff] %vm72_vm0, %v106_v33 }
  0x48   :  { %132 = vst.msk [vmem:[#allocation8 + $0x130] sm:$0xff] %vm72_vm0, %v107_v34  ;;  %133 = vst.msk [vmem:[#allocation8 + $0x138] sm:$0xff] %vm72_vm0, %v108_v35  ;;  %v109_v36 = vld [vmem:[#allocation5 + $0xa0] sm:$0xff]  ;;  %v110_v37 = vld [vmem:[#allocation5 + $0xa8] sm:$0xff] }
  0x49   :  { %v111_v38 = vld [vmem:[#allocation5 + $0xb0] sm:$0xff]  ;;  %134 = vst.msk [vmem:[#allocation8 + $0x140] sm:$0xff] %vm72_vm0, %v109_v36  ;;  %135 = vst.msk [vmem:[#allocation8 + $0x148] sm:$0xff] %vm72_vm0, %v110_v37  ;;  %v112_v39 = vld [vmem:[#allocation5 + $0xb8] sm:$0xff] }
  0x4a   :  { %136 = vst.msk [vmem:[#allocation8 + $0x150] sm:$0xff] %vm72_vm0, %v111_v38  ;;  %v138_v40 = vld [vmem:[#allocation7] sm:$0xff]  ;;  %v139_v41 = vld [vmem:[#allocation7 + $0x8] sm:$0xff]  ;;  %137 = vst.msk [vmem:[#allocation8 + $0x158] sm:$0xff] %vm72_vm0, %v112_v39 }
  0x4b   :  { %147 = vst.msk [vmem:[#allocation8 + $0xa0] sm:$0xff] %vm72_vm0, %v138_v40  ;;  %148 = vst.msk [vmem:[#allocation8 + $0xa8] sm:$0xff] %vm72_vm0, %v139_v41  ;;  %v140_v42 = vld [vmem:[#allocation7 + $0x10] sm:$0xff]  ;;  %v141_v43 = vld [vmem:[#allocation7 + $0x18] sm:$0xff] }
  0x4c   :  { %v142_v44 = vld [vmem:[#allocation7 + $0x20] sm:$0xff]  ;;  %149 = vst.msk [vmem:[#allocation8 + $0xb0] sm:$0xff] %vm72_vm0, %v140_v42  ;;  %150 = vst.msk [vmem:[#allocation8 + $0xb8] sm:$0xff] %vm72_vm0, %v141_v43  ;;  %v143_v45 = vld [vmem:[#allocation7 + $0x28] sm:$0xff] }
  0x4d   :  { %151 = vst.msk [vmem:[#allocation8 + $0x160] sm:$0xff] %vm72_vm0, %v142_v44  ;;  %v144_v46 = vld [vmem:[#allocation7 + $0x30] sm:$0xff]  ;;  %v145_v47 = vld [vmem:[#allocation7 + $0x38] sm:$0xff]  ;;  %152 = vst.msk [vmem:[#allocation8 + $0x168] sm:$0xff] %vm72_vm0, %v143_v45 }
  0x4e   :  { %153 = vst.msk [vmem:[#allocation8 + $0x170] sm:$0xff] %vm72_vm0, %v144_v46  ;;  %154 = vst.msk [vmem:[#allocation8 + $0x178] sm:$0xff] %vm72_vm0, %v145_v47 }
  0x4f   :  { %256 = shalt.err (!%p253_p0)
}
  0x50   :  { %s257_s27 = scalar_lea.hbm %s417_s3, 6144 }
  0x51   :  { %p258_p1 = scmp.ne.s32.totalorder %s417_s3, %s257_s27  ;;  %p261_p2 = scmp.lt.u32.totalorder %s257_s27, %s417_s3 }
  0x53   :  { %p263_p3 = pnand %p261_p2, %p258_p1 }
  0x55   :  { %266 = shalt.err (!%p263_p3)
}
  0x56   :  { %166 = dma.vmem_to_hbm [thread:$0]  %s161_s21, 6144, %s417_s3, [#allocation4], %s275_s24, %s275_s24, %s276_s25  }
  0x57   :  { %271 = dma.done.wait [#allocation4], 6144  }
  0x58   :  { %272 = vsyncadd [#allocation4], 4294961152 }
  0x59   :  { %170 = vsyncpa [#allocation3], 1 }
  0x5a   :  { %171 = vsyncpa [#allocation6], 1 }
  0x5b   :  { %172 = vsyncpa [#allocation4], 1 }

</bundles_post_ra>
